<compile_context>
chip_gen: v7x
topology: tpu7x:2x2x1
jax: 0.10.0
libtpu: 0.0.40
codegen_flags: <defaults>
</compile_context>

<pallas_src>
import functools

import jax
import jax.numpy as jnp
from jax.experimental import pallas as pl
from jax.experimental.pallas import tpu as pltpu


def _conv_bn_mish_kernel(p_ref, w_ref, o_ref):
    # p_ref: (TAPS+1, N*HW)  im2col patches + constant-1 bias row, lane-dense
    # w_ref: (Cout, TAPS+1)  conv weights with BN scale folded + BN bias column
    # o_ref: (Cout, N*HW)    lane-dense output (N*HW multiple of 128)
    #
    # Single fused matmul: conv + BN (scale & bias) in one MXU pass.
    y = jnp.dot(w_ref[...], p_ref[...], preferred_element_type=jnp.float32)

    # Mish(y) = y * tanh(softplus(y))
    #         = y * ((1 + e^y)^2 - 1) / ((1 + e^y)^2 + 1)
    # Single exp (EUP) + approx reciprocal (EUP) with one Newton step (VPU).
    # num = (1+t)^2 - 1 = t*(2+t)  -- cancellation-free for tiny t (y << 0).
    # den = num + 2.
    # Clamp before exp; for large y, mish(y) ~= y, so pass y through.
    y_c = jnp.minimum(y, 20.0)
    t = jnp.exp(y_c)
    num = t * (2.0 + t)
    den = num + 2.0
    r = pl.reciprocal(den, approx=True)
    r = r * (2.0 - den * r)              # Newton refinement -> ~f32-exact
    mish = jnp.where(y > 20.0, y, y * num * r)

    o_ref[...] = mish.astype(o_ref.dtype)


@functools.partial(jax.jit, static_argnames=("filter_size", "stride"))
def conv2d_unit_forward(x_nchw, weight_oihw, bn_gamma, bn_beta, bn_mean, bn_var,
                        *, filter_size=3, stride=1, eps=1e-5):
    """Forward pass of Conv2dUnit (conv + BN(inference) + Mish).

    x_nchw:      (N, Cin, H, W)   -- PyTorch layout
    weight_oihw: (Cout, Cin, KH, KW)
    returns:     (N, Cout, H, W)  in NCHW
    """
    assert stride == 1, "this kernel instantiation handles stride=1"
    N, Cin, H, W = x_nchw.shape
    Cout = weight_oihw.shape[0]
    K = filter_size
    pad = (K - 1) // 2
    HW = H * W
    NHW = N * HW
    TAPS = K * K * Cin

    # ---- trace-time glue (plain XLA): padding, im2col, BN folding ----
    x_pad = jnp.pad(x_nchw.astype(jnp.float32),
                    ((0, 0), (0, 0), (pad, pad), (pad, pad)))
    taps = []
    for kh in range(K):
        for kw in range(K):
            taps.append(x_pad[:, :, kh:kh + H, kw:kw + W])     # (N, Cin, H, W)
    # tap index t = (kh*K + kw)*Cin + ci ; column index c = n*HW + h*W + w
    patches = jnp.stack(taps, axis=1).reshape(N, TAPS, HW)     # (N, TAPS, HW)
    patches = jnp.transpose(patches, (1, 0, 2)).reshape(TAPS, NHW)
    # Constant-1 row so the BN bias rides inside the matmul.
    patches = jnp.concatenate(
        [patches, jnp.ones((1, NHW), jnp.float32)], axis=0)    # (TAPS+1, NHW)

    scale = bn_gamma / jnp.sqrt(bn_var + eps)                  # (Cout,)
    w2 = jnp.transpose(weight_oihw, (0, 2, 3, 1)).reshape(Cout, TAPS)
    w2 = w2 * scale[:, None]                                   # fold BN scale
    bias = (bn_beta - bn_mean * scale).reshape(Cout, 1)        # fused BN bias
    wb = jnp.concatenate([w2, bias], axis=1).astype(jnp.float32)  # (Cout, TAPS+1)

    cost = pl.CostEstimate(
        flops=2 * Cout * (TAPS + 1) * NHW,
        transcendentals=Cout * NHW,
        bytes_accessed=(patches.size + wb.size + Cout * NHW) * 4)

    # Whole problem fits in VMEM -> single invocation, no grid.
    out_flat = pl.pallas_call(
        _conv_bn_mish_kernel,
        out_shape=jax.ShapeDtypeStruct((Cout, NHW), x_nchw.dtype),
        in_specs=[
            pl.BlockSpec(memory_space=pltpu.MemorySpace.VMEM),  # patches
            pl.BlockSpec(memory_space=pltpu.MemorySpace.VMEM),  # folded weights
        ],
        out_specs=pl.BlockSpec(memory_space=pltpu.MemorySpace.VMEM),
        cost_estimate=cost,
    )(patches, wb)

    # (Cout, N*HW) -> (N, Cout, H, W): ~16 KiB fixup in XLA, negligible.
    out = jnp.transpose(out_flat.reshape(Cout, N, HW), (1, 0, 2))
    return out.reshape(N, Cout, H, W)


def _reference_forward(x_nchw, weight_oihw, bn_gamma, bn_beta, bn_mean, bn_var,
                       eps=1e-5):
    y = jax.lax.conv_general_dilated(
        x_nchw.astype(jnp.float32), weight_oihw.astype(jnp.float32),
        window_strides=(1, 1), padding=((1, 1), (1, 1)),
        dimension_numbers=("NCHW", "OIHW", "NCHW"))
    scale = bn_gamma / jnp.sqrt(bn_var + eps)
    bias = bn_beta - bn_mean * scale
    y = y * scale[None, :, None, None] + bias[None, :, None, None]
    return y * jnp.tanh(jax.nn.softplus(y))


if __name__ == "__main__":
    key = jax.random.PRNGKey(0)
    k_x, k_w, k_g, k_b, k_m, k_v = jax.random.split(key, 6)

    N, Cin, H, W = 2, 4, 16, 16
    Cout, K = 8, 3

    x = jax.random.normal(k_x, (N, Cin, H, W), jnp.float32)
    weight = jax.random.normal(k_w, (Cout, Cin, K, K), jnp.float32) * 0.1
    bn_gamma = 1.0 + 0.1 * jax.random.normal(k_g, (Cout,), jnp.float32)
    bn_beta = 0.1 * jax.random.normal(k_b, (Cout,), jnp.float32)
    bn_mean = 0.1 * jax.random.normal(k_m, (Cout,), jnp.float32)
    bn_var = jnp.abs(jax.random.normal(k_v, (Cout,), jnp.float32)) + 0.5

    out = conv2d_unit_forward(x, weight, bn_gamma, bn_beta, bn_mean, bn_var,
                              filter_size=K, stride=1)
    out = jax.block_until_ready(out)

    ref = _reference_forward(x, weight, bn_gamma, bn_beta, bn_mean, bn_var)
    assert out.shape == (N, Cout, H, W)
    assert jnp.allclose(out, ref, atol=2e-4, rtol=2e-4), (
        float(jnp.max(jnp.abs(out - ref))))

    print("KERNEL_OK")
</pallas_src>

<mosaic_0001>
module attributes {stable_mosaic.version = 11 : i64} {
  func.func @_conv_bn_mish_kernel(%arg0: memref<37x512xf32, #tpu.memory_space<vmem>>, %arg1: memref<8x37xf32, #tpu.memory_space<vmem>>, %arg2: memref<8x512xf32, #tpu.memory_space<vmem>>) attributes {dimension_semantics = [], scalar_prefetch = 0 : i64, scratch_operands = 0 : i64, tpu.core_type = #tpu.core_type<tc>} {
    %c0 = arith.constant 0 : index
    %c0_0 = arith.constant 0 : index
    %0 = vector.load %arg1[%c0, %c0_0] : memref<8x37xf32, #tpu.memory_space<vmem>>, vector<8x37xf32>
    %c0_1 = arith.constant 0 : index
    %c0_2 = arith.constant 0 : index
    %1 = vector.load %arg0[%c0_1, %c0_2] : memref<37x512xf32, #tpu.memory_space<vmem>>, vector<37x512xf32>
    %cst = arith.constant dense<0.000000e+00> : vector<8x512xf32>
    %2 = tpu.matmul %0, %1, %cst {dimension_numbers = #tpu.dot_dimension_numbers<[1], [0], [0], [1], [0, 0, 1, 1], [], []>} : vector<8x37xf32>, vector<37x512xf32>, vector<8x512xf32> -> vector<8x512xf32>
    %cst_3 = arith.constant 2.000000e+01 : f32
    %3 = vector.broadcast %cst_3 : f32 to vector<8x512xf32>
    %4 = arith.minimumf %2, %3 : vector<8x512xf32>
    %5 = math.exp %4 : vector<8x512xf32>
    %cst_4 = arith.constant 2.000000e+00 : f32
    %6 = vector.broadcast %cst_4 : f32 to vector<8x512xf32>
    %7 = arith.addf %6, %5 : vector<8x512xf32>
    %8 = arith.mulf %5, %7 : vector<8x512xf32>
    %cst_5 = arith.constant 2.000000e+00 : f32
    %9 = vector.broadcast %cst_5 : f32 to vector<8x512xf32>
    %10 = arith.addf %8, %9 : vector<8x512xf32>
    %11 = tpu.reciprocal %10 {approx = true} : vector<8x512xf32> -> vector<8x512xf32>
    %12 = arith.mulf %10, %11 : vector<8x512xf32>
    %cst_6 = arith.constant 2.000000e+00 : f32
    %13 = vector.broadcast %cst_6 : f32 to vector<8x512xf32>
    %14 = arith.subf %13, %12 : vector<8x512xf32>
    %15 = arith.mulf %11, %14 : vector<8x512xf32>
    %cst_7 = arith.constant 2.000000e+01 : f32
    %16 = vector.broadcast %cst_7 : f32 to vector<8x512xf32>
    %17 = arith.cmpf ogt, %2, %16 : vector<8x512xf32>
    %18 = arith.mulf %2, %8 : vector<8x512xf32>
    %19 = arith.mulf %18, %15 : vector<8x512xf32>
    %20 = arith.select %17, %2, %19 : vector<8x512xi1>, vector<8x512xf32>
    %c0_8 = arith.constant 0 : index
    %c0_9 = arith.constant 0 : index
    %21 = vector.load %arg2[%c0_8, %c0_9] : memref<8x512xf32, #tpu.memory_space<vmem>>, vector<8x512xf32>
    tpu.vector_store %arg2[%c0_8, %c0_9], %20 {strides = array<i32>} : memref<8x512xf32, #tpu.memory_space<vmem>>, vector<8x512xf32>,
    return
  }
}

</mosaic_0001>

<bundles_post_ra>
// kernel: conv2d_unit_forward.1
= control target key start
LH: loop header
LB: loop body
LE: loop exit
PB: predicated region body
PF: predicated region fallthrough
CT: control target
= control target key end

     0   :  { %v294_v3 = vmov 0.0   ;;  %vm36_vm0 = vcmask 1044480   ;;  %vm32_vm1 = vcmask 302080   ;;  %s403_s0 = inlined_call_operand.vmem [shape: f32[37,512], index: 0, kind: input, shape index: {}]   ;;  %s404_s1 = inlined_call_operand.vmem [shape: f32[8,37], index: 1, kind: input, shape index: {}]   ;;  %s405_s2 = inlined_call_operand.vmem [shape: f32[8,512], index: 2, kind: output, shape index: {}]  }
   0x1   :  { %v13_v0 = vld [vmem:[%s403_s0 + $0x8] sm:$0xff]  ;;  %v15_v2 = vld [vmem:[%s403_s0 + $0x18] sm:$0xff]  ;;  %113 = vmatprep.mubr.f32.mxu0 %v294_v3  ;;  %184 = vmatprep.mubr.f32.mxu1 %v294_v3  ;;  %v12_v6 = vld [vmem:[%s403_s0] sm:$0xff] }
   0x2   :  { %v17_v1 = vld [vmem:[%s403_s0 + $0x28] sm:$0xff]  ;;  %v19_v5 = vld [vmem:[%s403_s0 + $0x38] sm:$0xff]  ;;  %v16_v7 = vld [vmem:[%s403_s0 + $0x20] sm:$0xff] }
   0x3   :  { %v261_v4 = vpack.c.bf16 %v17_v1, %v13_v0  ;;  %v269_v8 = vpack.c.bf16 %v19_v5, %v15_v2  ;;  %v263_v9 = vpack.c.bf16 %v16_v7, %v12_v6  ;;  %v14_v10 = vld [vmem:[%s403_s0 + $0x10] sm:$0xff]  ;;  %v21_v12 = vld [vmem:[%s403_s0 + $0x48] sm:$0xff]  ;;  %v23_v15 = vld [vmem:[%s403_s0 + $0x58] sm:$0xff] }
   0x4   :  { %v18_v11 = vld [vmem:[%s403_s0 + $0x30] sm:$0xff]  ;;  %v25_v14 = vld [vmem:[%s403_s0 + $0x68] sm:$0xff]  ;;  %v27_v16 = vld [vmem:[%s403_s0 + $0x78] sm:$0xff] }
   0x5   :  { %262 = vmatprep.subr.bf16.mxu0 %v261_v4  ;;  %v271_v13 = vpack.c.bf16 %v18_v11, %v14_v10  ;;  %270 = vmatprep.subr.bf16.mxu1 %v269_v8  ;;  %v265_v17 = vpack.c.bf16 %v25_v14, %v21_v12  ;;  %v273_v18 = vpack.c.bf16 %v27_v16, %v23_v15  ;;  %v20_v19 = vld [vmem:[%s403_s0 + $0x40] sm:$0xff]  ;;  %v22_v21 = vld [vmem:[%s403_s0 + $0x50] sm:$0xff]  ;;  %v29_v25 = vld [vmem:[%s403_s0 + $0x88] sm:$0x1f] }
   0x6   :  { %264 = vmatpush1.bf16.msra.mxu0 %v263_v9  ;;  %v24_v20 = vld [vmem:[%s403_s0 + $0x60] sm:$0xff]  ;;  %v26_v23 = vld [vmem:[%s403_s0 + $0x70] sm:$0xff]  ;;  %v31_v26 = vld [vmem:[%s403_s0 + $0x98] sm:$0x1f] }
   0x7   :  { %272 = vmatpush1.bf16.msra.mxu1 %v271_v13  ;;  %v267_v22 = vpack.c.bf16 %v24_v20, %v20_v19  ;;  %266 = vmatprep.subr.bf16.mxu0 %v265_v17  ;;  %v275_v24 = vpack.c.bf16 %v26_v23, %v22_v21  ;;  %v28_v27 = vld [vmem:[%s403_s0 + $0x80] sm:$0x1f]  ;;  %v30_v28 = vld [vmem:[%s403_s0 + $0x90] sm:$0x1f] }
   0x8   :  { %274 = vmatprep.subr.bf16.mxu1 %v273_v18  ;;  %v11_v29 = vld [vmem:[%s404_s1] sm:$0xff] }
   0xa   :  { %268 = vmatpush1.bf16.msra.mxu0 %v267_v22 }
   0xb   :  { %276 = vmatpush1.bf16.msra.mxu1 %v275_v24  ;;  %255 = vmatprep.subr.msk.mxu0 %vm36_vm0, %v29_v25 }
   0xc   :  { %258 = vmatprep.subr.msk.mxu1 %vm36_vm0, %v31_v26 }
   0xe   :  { %256 = vmatpush1.msk.msra.mxu0 %vm36_vm0, %v28_v27 }
   0xf   :  { %259 = vmatpush1.msk.msra.mxu1 %vm36_vm0, %v30_v28  ;;  %257 = vmatmul.mubr.msk.f32.vlgmr.msra.gmra.mrb[0].mxu0 %vm32_vm1, %v11_v29 }
  0x10   :  { %260 = vmatmul.mubr.msk.f32.vlgmr.msra.gmra.mrb[0].mxu1 %vm32_vm1, %v11_v29 }
  0xe2   :  { %v115_v30 = vpop.f32.mrb[0].mxu0 }
  0xe3   :  { %v191_v31 = vmin.f32 %v115_v30, 20.0  ;;  %v373_v32 = vpop.f32.mrb[0].mxu1  ;;  %v375_v33 = vpop.f32.mrb[1].mxu0  ;;  %vm231_vm2 = vcmp.gt.f32.partialorder %v115_v30, 20.0 }
  0xe4   :  { %v193_v34 = vmin.f32 %v373_v32, 20.0  ;;  %v192_v35 = vmin.f32 %v375_v33, 20.0  ;;  %v379_v36 = vpop.f32.mrb[1].mxu1  ;;  %vm233_vm3 = vcmp.gt.f32.partialorder %v373_v32, 20.0  ;;  %vm232_vm4 = vcmp.gt.f32.partialorder %v375_v33, 20.0 }
  0xe5   :  { %v195_v37 = vmul.f32 1.442695, %v191_v31  ;;  %v194_v38 = vmin.f32 %v379_v36, 20.0  ;;  %vm234_vm5 = vcmp.gt.f32.partialorder %v379_v36, 20.0 }
  0xe6   :  { %v199_v39 = vmul.f32 1.442695, %v193_v34  ;;  %v197_v40 = vmul.f32 1.442695, %v192_v35 }
  0xe7   :  { %278 = vpow2.f32 %v195_v37  ;;  %v201_v41 = vmul.f32 1.442695, %v194_v38 }
  0xe8   :  { %280 = vpow2.f32 %v199_v39 }
  0xe9   :  { %282 = vpow2.f32 %v197_v40 }
  0xea   :  { %284 = vpow2.f32 %v201_v41 }
  0xf1   :  { %v279_v42 = vpop.eup %278 }
  0xf2   :  { %v281_v43 = vpop.eup %280  ;;  %v203_v44 = vadd.f32 2.0, %v279_v42 }
  0xf3   :  { %v283_v45 = vpop.eup %282  ;;  %v205_v46 = vadd.f32 2.0, %v281_v43 }
  0xf4   :  { %v285_v47 = vpop.eup %284  ;;  %v207_v48 = vmul.f32 %v279_v42, %v203_v44  ;;  %v204_v49 = vadd.f32 2.0, %v283_v45 }
  0xf5   :  { %v209_v50 = vmul.f32 %v281_v43, %v205_v46  ;;  %v206_v51 = vadd.f32 2.0, %v285_v47 }
  0xf6   :  { %v211_v52 = vadd.f32 2.0, %v207_v48  ;;  %v208_v53 = vmul.f32 %v283_v45, %v204_v49  ;;  %v235_v5 = vmul.f32 %v207_v48, %v115_v30 }
  0xf7   :  { %v213_v54 = vadd.f32 2.0, %v209_v50  ;;  %v210_v55 = vmul.f32 %v285_v47, %v206_v51  ;;  %v237_v8 = vmul.f32 %v209_v50, %v373_v32 }
  0xf8   :  { %286 = vrcp.f32 %v211_v52  ;;  %v212_v56 = vadd.f32 2.0, %v208_v53  ;;  %v236_v12 = vmul.f32 %v208_v53, %v375_v33 }
  0xf9   :  { %288 = vrcp.f32 %v213_v54  ;;  %v214_v57 = vadd.f32 2.0, %v210_v55  ;;  %v238_v15 = vmul.f32 %v210_v55, %v379_v36 }
  0xfa   :  { %290 = vrcp.f32 %v212_v56 }
  0xfb   :  { %292 = vrcp.f32 %v214_v57 }
 0x102   :  { %v287_v58 = vpop.eup %286 }
 0x103   :  { %v289_v59 = vpop.eup %288  ;;  %v219_v60 = vmul.f32 %v287_v58, %v211_v52 }
 0x104   :  { %v291_v61 = vpop.eup %290  ;;  %v221_v62 = vmul.f32 %v289_v59, %v213_v54 }
 0x105   :  { %v293_v63 = vpop.eup %292  ;;  %v223_v0 = vsub.f32 2.0, %v219_v60  ;;  %v220_v1 = vmul.f32 %v291_v61, %v212_v56 }
 0x106   :  { %v225_v2 = vsub.f32 2.0, %v221_v62  ;;  %v222_v3 = vmul.f32 %v293_v63, %v214_v57 }
 0x107   :  { %v227_v4 = vmul.f32 %v287_v58, %v223_v0  ;;  %v224_v6 = vsub.f32 2.0, %v220_v1 }
 0x108   :  { %v229_v7 = vmul.f32 %v289_v59, %v225_v2  ;;  %v226_v9 = vsub.f32 2.0, %v222_v3 }
 0x109   :  { %v239_v10 = vmul.f32 %v235_v5, %v227_v4  ;;  %v228_v11 = vmul.f32 %v291_v61, %v224_v6 }
 0x10a   :  { %v241_v13 = vmul.f32 %v237_v8, %v229_v7  ;;  %v230_v14 = vmul.f32 %v293_v63, %v226_v9 }
 0x10b   :  { %v243_v16 = vsel %vm231_vm2, %v115_v30, %v239_v10  ;;  %v240_v17 = vmul.f32 %v236_v12, %v228_v11 }
 0x10c   :  { %247 = vst [vmem:[%s405_s2] sm:$0xff] %v243_v16  ;;  %v245_v18 = vsel %vm233_vm3, %v373_v32, %v241_v13  ;;  %v242_v19 = vmul.f32 %v238_v15, %v230_v14 }
 0x10d   :  { %249 = vst [vmem:[%s405_s2 + $0x10] sm:$0xff] %v245_v18  ;;  %v244_v20 = vsel %vm232_vm4, %v375_v33, %v240_v17 }
 0x10e   :  { %248 = vst [vmem:[%s405_s2 + $0x8] sm:$0xff] %v244_v20  ;;  %v246_v21 = vsel %vm234_vm5, %v379_v36, %v242_v19 }
 0x10f   :  { %250 = vst [vmem:[%s405_s2 + $0x18] sm:$0xff] %v246_v21 }

</bundles_post_ra>
